<compile_context>
chip_gen: v5e
topology: v5e:2x2
jax: 0.10.0
libtpu: 0.0.40
codegen_flags: <defaults>
</compile_context>

<pallas_src>
import jax
import jax.numpy as jnp
from jax import lax
from jax.experimental import pallas as pl
from jax.experimental.pallas import tpu as pltpu


def _pick_tile_l(L, requested):
    t = min(L, 512 if requested is None else requested)
    if t >= L:
        return L
    # a proper tile (< L) must divide L and be a multiple of 8 (sublane rule)
    while t >= 8 and (L % t != 0 or t % 8 != 0):
        t -= 1
    return t if t >= 8 else L


def conv_feed_forward(x, w1, b1, w2, b2, *, tile_l=None, batch_block=1,
                      compute_dtype=jnp.bfloat16):
    """x: (B, L, d_model).  Weights in PyTorch Conv1d layout:
       w1: (d_ff, d_model, 3), b1: (d_ff,), w2: (d_model, d_ff, 3), b2: (d_model,).
       Returns (B, L, d_model) in x.dtype."""
    B, L, d_model = x.shape
    d_ff = w1.shape[0]

    T = _pick_tile_l(L, tile_l)
    n_tiles = L // T
    if B % batch_block != 0:
        batch_block = 1
    Bt = batch_block

    # ---- wrapper-side layout plumbing (one-time) --------------------------
    # 2 zero rows of halo on each side of the sequence; overlapping (T+4)-row tiles.
    x_pad = jnp.pad(x, ((0, 0), (2, 2), (0, 0)))
    idx = (jnp.arange(n_tiles) * T)[:, None] + jnp.arange(T + 4)[None, :]
    x_tiles = x_pad[:, idx, :].astype(compute_dtype)        # (B, n_tiles, T+4, d_model)

    def fuse_taps(w):                                        # (Cout, Cin, 3) -> (3*Cin, Cout)
        return jnp.transpose(w, (2, 1, 0)).reshape(3 * w.shape[1], w.shape[0])

    w1f = fuse_taps(w1).astype(compute_dtype)                # (3*d_model, d_ff)
    w2f = fuse_taps(w2).astype(compute_dtype)                # (3*d_ff,    d_model)
    b1r = b1.reshape(1, d_ff).astype(jnp.float32)
    b2r = b2.reshape(1, d_model).astype(jnp.float32)

    fuse1 = d_model < 128      # single K=3*Cin matmul when channels are narrow
    fuse2 = d_ff < 128

    def tap_dot(a, w, cin, fuse):
        # a: (m+2, cin) rows covering [g-1 .. g+m]; returns (m, cout) k=3 conv.
        m = a.shape[0] - 2
        prev, cur, nxt = a[0:m, :], a[1:m + 1, :], a[2:m + 2, :]
        if fuse:
            cat = jnp.concatenate([prev, cur, nxt], axis=-1)          # (m, 3*cin)
            return jnp.dot(cat, w, preferred_element_type=jnp.float32)
        return (jnp.dot(prev, w[0:cin, :], preferred_element_type=jnp.float32)
                + jnp.dot(cur, w[cin:2 * cin, :], preferred_element_type=jnp.float32)
                + jnp.dot(nxt, w[2 * cin:3 * cin, :], preferred_element_type=jnp.float32))

    def kernel(x_ref, w1_ref, b1_ref, w2_ref, b2_ref, o_ref):
        # x_ref: (Bt, T+4, d_model) compute_dtype;  o_ref: (Bt, T, d_model)
        w1v, w2v = w1_ref[...], w2_ref[...]
        b1v, b2v = b1_ref[...], b2_ref[...]

        # Hidden-activation halo rows whose global index is outside [0, L) stand
        # in for conv2's zero padding -> force them to exactly zero.
        g0 = pl.program_id(1) * T - 1
        row = g0 + lax.broadcasted_iota(jnp.int32, (T + 2, 1), 0)
        h_valid = jnp.logical_and(row >= 0, row < pl.num_programs(1) * T)

        for b in range(Bt):                                   # static unroll
            xb = x_ref[b]                                     # (T+4, d_model)
            h = tap_dot(xb, w1v, d_model, fuse1) + b1v        # (T+2, d_ff) f32 acc
            h = jnp.maximum(h, 0.0)
            h = jnp.where(h_valid, h, 0.0).astype(w2v.dtype)  # mask halo, cast once
            y = tap_dot(h, w2v, d_ff, fuse2) + b2v            # (T, d_model) f32 acc
            o_ref[b] = y.astype(o_ref.dtype)

    return pl.pallas_call(
        kernel,
        out_shape=jax.ShapeDtypeStruct((B, L, d_model), x.dtype),
        grid_spec=pltpu.PrefetchScalarGridSpec(
            num_scalar_prefetch=0,
            grid=(B // Bt, n_tiles),
            in_specs=[
                pl.BlockSpec((Bt, pl.Squeezed(), T + 4, d_model),
                             lambda bi, ti: (bi, ti, 0, 0)),
                pl.BlockSpec((3 * d_model, d_ff), lambda bi, ti: (0, 0)),
                pl.BlockSpec((1, d_ff), lambda bi, ti: (0, 0)),
                pl.BlockSpec((3 * d_ff, d_model), lambda bi, ti: (0, 0)),
                pl.BlockSpec((1, d_model), lambda bi, ti: (0, 0)),
            ],
            out_specs=pl.BlockSpec((Bt, T, d_model), lambda bi, ti: (bi, ti, 0)),
        ),
        compiler_params=pltpu.CompilerParams(
            dimension_semantics=("parallel", "parallel"),
            vmem_limit_bytes=48 * 1024 * 1024,
        ),
    )(x_tiles, w1f, b1r, w2f, b2r)


def reference(x, w1, b1, w2, b2):
    # Pure-JAX mirror of the PyTorch module (NCW Conv1d, zero 'same' padding).
    xc = jnp.transpose(x, (0, 2, 1))                          # (B, d_model, L)
    dn = ("NCW", "OIW", "NCW")
    h = lax.conv_general_dilated(xc, w1, (1,), "SAME", dimension_numbers=dn)
    h = jnp.maximum(h + b1[None, :, None], 0.0)
    y = lax.conv_general_dilated(h, w2, (1,), "SAME", dimension_numbers=dn)
    y = y + b2[None, :, None]
    return jnp.transpose(y, (0, 2, 1))                        # (B, L, d_model)


if __name__ == "__main__":
    B, L, d_model, d_ff = 2, 16, 32, 64

    key = jax.random.PRNGKey(0)
    kx, k1, k2, k3, k4 = jax.random.split(key, 5)

    x = jax.random.normal(kx, (B, L, d_model), dtype=jnp.float32)
    # PyTorch Conv1d parameter layout: weight (Cout, Cin, 3), bias (Cout,)
    w1 = jax.random.normal(k1, (d_ff, d_model, 3), dtype=jnp.float32) * 0.1
    b1 = jax.random.normal(k2, (d_ff,), dtype=jnp.float32) * 0.1
    w2 = jax.random.normal(k3, (d_model, d_ff, 3), dtype=jnp.float32) * 0.1
    b2 = jax.random.normal(k4, (d_model,), dtype=jnp.float32) * 0.1

    ref = reference(x, w1, b1, w2, b2)

    # f32 compute path with 2 sequence tiles + 2 batch elements per step
    # (exercises the halo seams and the batched block path); tight tolerance.
    out_f32 = conv_feed_forward(x, w1, b1, w2, b2, tile_l=8, batch_block=2,
                                compute_dtype=jnp.float32)
    out_f32 = jax.block_until_ready(out_f32)
    assert out_f32.shape == (B, L, d_model)
    assert jnp.allclose(out_f32, ref, atol=2e-4, rtol=2e-4), "f32 path mismatch vs reference"

    # default bf16 MXU path (f32 accumulation); looser tolerance for bf16 inputs.
    out_bf16 = conv_feed_forward(x, w1, b1, w2, b2)
    out_bf16 = jax.block_until_ready(out_bf16)
    assert out_bf16.shape == (B, L, d_model)
    assert jnp.allclose(out_bf16, ref, atol=5e-2, rtol=5e-2), "bf16 path mismatch vs reference"

    print("KERNEL_OK")
</pallas_src>

<mosaic_0001>
module attributes {stable_mosaic.version = 11 : i64} {
  func.func @kernel(%arg0: i32, %arg1: i32, %arg2: memref<2x1x12x32xf32, #tpu.memory_space<vmem>>, %arg3: memref<96x64xf32, #tpu.memory_space<vmem>>, %arg4: memref<1x64xf32, #tpu.memory_space<vmem>>, %arg5: memref<192x32xf32, #tpu.memory_space<vmem>>, %arg6: memref<1x32xf32, #tpu.memory_space<vmem>>, %arg7: memref<2x8x32xf32, #tpu.memory_space<vmem>>) attributes {dimension_semantics = [#tpu.dimension_semantics<parallel>, #tpu.dimension_semantics<parallel>], iteration_bounds = array<i64: 1, 2>, scalar_prefetch = 0 : i64, scratch_operands = 0 : i64, tpu.core_type = #tpu.core_type<tc>, window_params = [{transform_indices = @transform_0, window_bounds = array<i64: 2, 1, 12, 32>}, {pipeline_mode = #tpu.pipeline_mode<synchronous>, transform_indices = @transform_1, window_bounds = array<i64: 96, 64>}, {pipeline_mode = #tpu.pipeline_mode<synchronous>, transform_indices = @transform_2, window_bounds = array<i64: 1, 64>}, {pipeline_mode = #tpu.pipeline_mode<synchronous>, transform_indices = @transform_3, window_bounds = array<i64: 192, 32>}, {pipeline_mode = #tpu.pipeline_mode<synchronous>, transform_indices = @transform_4, window_bounds = array<i64: 1, 32>}, {transform_indices = @transform_5, window_bounds = array<i64: 2, 8, 32>}]} {
    %c0 = arith.constant 0 : index
    %c0_0 = arith.constant 0 : index
    %0 = vector.load %arg3[%c0, %c0_0] : memref<96x64xf32, #tpu.memory_space<vmem>>, vector<96x64xf32>
    %c0_1 = arith.constant 0 : index
    %c0_2 = arith.constant 0 : index
    %1 = vector.load %arg5[%c0_1, %c0_2] : memref<192x32xf32, #tpu.memory_space<vmem>>, vector<192x32xf32>
    %c0_3 = arith.constant 0 : index
    %c0_4 = arith.constant 0 : index
    %2 = vector.load %arg4[%c0_3, %c0_4] : memref<1x64xf32, #tpu.memory_space<vmem>>, vector<1x64xf32>
    %c0_5 = arith.constant 0 : index
    %c0_6 = arith.constant 0 : index
    %3 = vector.load %arg6[%c0_5, %c0_6] : memref<1x32xf32, #tpu.memory_space<vmem>>, vector<1x32xf32>
    %c8_i32 = arith.constant 8 : i32
    %4 = arith.muli %arg1, %c8_i32 : i32
    %c1_i32 = arith.constant 1 : i32
    %5 = arith.subi %4, %c1_i32 : i32
    %6 = tpu.iota {dimensions = array<i32: 0>} : vector<10x1xi32>
    %7 = vector.broadcast %5 : i32 to vector<10x1xi32>
    %8 = arith.addi %7, %6 : vector<10x1xi32>
    %c0_i32 = arith.constant 0 : i32
    %9 = vector.broadcast %c0_i32 : i32 to vector<10x1xi32>
    %10 = arith.cmpi sge, %8, %9 : vector<10x1xi32>
    %c16_i32 = arith.constant 16 : i32
    %11 = vector.broadcast %c16_i32 : i32 to vector<10x1xi32>
    %12 = arith.cmpi slt, %8, %11 : vector<10x1xi32>
    %13 = arith.andi %10, %12 : vector<10x1xi1>
    %c0_7 = arith.constant 0 : index
    %c0_8 = arith.constant 0 : index
    %c0_9 = arith.constant 0 : index
    %c0_10 = arith.constant 0 : index
    %14 = vector.load %arg2[%c0_7, %c0_8, %c0_9, %c0_10] : memref<2x1x12x32xf32, #tpu.memory_space<vmem>>, vector<1x1x12x32xf32>
    %15 = vector.shape_cast %14 : vector<1x1x12x32xf32> to vector<12x32xf32>
    %16 = vector.extract_strided_slice %15 {offsets = [0, 0], sizes = [10, 32], strides = [1, 1]} : vector<12x32xf32> to vector<10x32xf32>
    %17 = vector.extract_strided_slice %15 {offsets = [1, 0], sizes = [10, 32], strides = [1, 1]} : vector<12x32xf32> to vector<10x32xf32>
    %18 = vector.extract_strided_slice %15 {offsets = [2, 0], sizes = [10, 32], strides = [1, 1]} : vector<12x32xf32> to vector<10x32xf32>
    %19 = tpu.concatenate %16, %17, %18 in 1 : vector<10x32xf32>, vector<10x32xf32>, vector<10x32xf32> -> vector<10x96xf32>
    %cst = arith.constant dense<0.000000e+00> : vector<10x64xf32>
    %20 = tpu.matmul %19, %0, %cst {dimension_numbers = #tpu.dot_dimension_numbers<[1], [0], [0], [1], [0, 0, 1, 1], [], []>} : vector<10x96xf32>, vector<96x64xf32>, vector<10x64xf32> -> vector<10x64xf32>
    %21 = vector.broadcast %2 : vector<1x64xf32> to vector<10x64xf32>
    %22 = arith.addf %20, %21 : vector<10x64xf32>
    %cst_11 = arith.constant 0.000000e+00 : f32
    %23 = vector.broadcast %cst_11 : f32 to vector<10x64xf32>
    %24 = arith.maximumf %22, %23 : vector<10x64xf32>
    %cst_12 = arith.constant 0.000000e+00 : f32
    %25 = vector.shape_cast %13 : vector<10x1xi1> to vector<10x1xi1>
    %26 = vector.broadcast %25 : vector<10x1xi1> to vector<10x64xi1>
    %27 = vector.broadcast %cst_12 : f32 to vector<10x64xf32>
    %28 = arith.select %26, %24, %27 : vector<10x64xi1>, vector<10x64xf32>
    %29 = vector.extract_strided_slice %28 {offsets = [0, 0], sizes = [8, 64], strides = [1, 1]} : vector<10x64xf32> to vector<8x64xf32>
    %30 = vector.extract_strided_slice %28 {offsets = [1, 0], sizes = [8, 64], strides = [1, 1]} : vector<10x64xf32> to vector<8x64xf32>
    %31 = vector.extract_strided_slice %28 {offsets = [2, 0], sizes = [8, 64], strides = [1, 1]} : vector<10x64xf32> to vector<8x64xf32>
    %32 = tpu.concatenate %29, %30, %31 in 1 : vector<8x64xf32>, vector<8x64xf32>, vector<8x64xf32> -> vector<8x192xf32>
    %cst_13 = arith.constant dense<0.000000e+00> : vector<8x32xf32>
    %33 = tpu.matmul %32, %1, %cst_13 {dimension_numbers = #tpu.dot_dimension_numbers<[1], [0], [0], [1], [0, 0, 1, 1], [], []>} : vector<8x192xf32>, vector<192x32xf32>, vector<8x32xf32> -> vector<8x32xf32>
    %34 = vector.broadcast %3 : vector<1x32xf32> to vector<8x32xf32>
    %35 = arith.addf %33, %34 : vector<8x32xf32>
    %c0_14 = arith.constant 0 : index
    %c0_15 = arith.constant 0 : index
    %c0_16 = arith.constant 0 : index
    %36 = vector.load %arg7[%c0_14, %c0_15, %c0_16] : memref<2x8x32xf32, #tpu.memory_space<vmem>>, vector<1x8x32xf32>
    %37 = vector.shape_cast %36 : vector<1x8x32xf32> to vector<8x32xf32>
    %38 = vector.shape_cast %35 : vector<8x32xf32> to vector<1x8x32xf32>
    tpu.vector_store %arg7[%c0_14, %c0_15, %c0_16], %38 {strides = array<i32>} : memref<2x8x32xf32, #tpu.memory_space<vmem>>, vector<1x8x32xf32>,
    %c1 = arith.constant 1 : index
    %c0_17 = arith.constant 0 : index
    %c0_18 = arith.constant 0 : index
    %c0_19 = arith.constant 0 : index
    %39 = vector.load %arg2[%c1, %c0_17, %c0_18, %c0_19] : memref<2x1x12x32xf32, #tpu.memory_space<vmem>>, vector<1x1x12x32xf32>
    %40 = vector.shape_cast %39 : vector<1x1x12x32xf32> to vector<12x32xf32>
    %41 = vector.extract_strided_slice %40 {offsets = [0, 0], sizes = [10, 32], strides = [1, 1]} : vector<12x32xf32> to vector<10x32xf32>
    %42 = vector.extract_strided_slice %40 {offsets = [1, 0], sizes = [10, 32], strides = [1, 1]} : vector<12x32xf32> to vector<10x32xf32>
    %43 = vector.extract_strided_slice %40 {offsets = [2, 0], sizes = [10, 32], strides = [1, 1]} : vector<12x32xf32> to vector<10x32xf32>
    %44 = tpu.concatenate %41, %42, %43 in 1 : vector<10x32xf32>, vector<10x32xf32>, vector<10x32xf32> -> vector<10x96xf32>
    %cst_20 = arith.constant dense<0.000000e+00> : vector<10x64xf32>
    %45 = tpu.matmul %44, %0, %cst_20 {dimension_numbers = #tpu.dot_dimension_numbers<[1], [0], [0], [1], [0, 0, 1, 1], [], []>} : vector<10x96xf32>, vector<96x64xf32>, vector<10x64xf32> -> vector<10x64xf32>
    %46 = vector.broadcast %2 : vector<1x64xf32> to vector<10x64xf32>
    %47 = arith.addf %45, %46 : vector<10x64xf32>
    %cst_21 = arith.constant 0.000000e+00 : f32
    %48 = vector.broadcast %cst_21 : f32 to vector<10x64xf32>
    %49 = arith.maximumf %47, %48 : vector<10x64xf32>
    %cst_22 = arith.constant 0.000000e+00 : f32
    %50 = vector.shape_cast %13 : vector<10x1xi1> to vector<10x1xi1>
    %51 = vector.broadcast %50 : vector<10x1xi1> to vector<10x64xi1>
    %52 = vector.broadcast %cst_22 : f32 to vector<10x64xf32>
    %53 = arith.select %51, %49, %52 : vector<10x64xi1>, vector<10x64xf32>
    %54 = vector.extract_strided_slice %53 {offsets = [0, 0], sizes = [8, 64], strides = [1, 1]} : vector<10x64xf32> to vector<8x64xf32>
    %55 = vector.extract_strided_slice %53 {offsets = [1, 0], sizes = [8, 64], strides = [1, 1]} : vector<10x64xf32> to vector<8x64xf32>
    %56 = vector.extract_strided_slice %53 {offsets = [2, 0], sizes = [8, 64], strides = [1, 1]} : vector<10x64xf32> to vector<8x64xf32>
    %57 = tpu.concatenate %54, %55, %56 in 1 : vector<8x64xf32>, vector<8x64xf32>, vector<8x64xf32> -> vector<8x192xf32>
    %cst_23 = arith.constant dense<0.000000e+00> : vector<8x32xf32>
    %58 = tpu.matmul %57, %1, %cst_23 {dimension_numbers = #tpu.dot_dimension_numbers<[1], [0], [0], [1], [0, 0, 1, 1], [], []>} : vector<8x192xf32>, vector<192x32xf32>, vector<8x32xf32> -> vector<8x32xf32>
    %59 = vector.broadcast %3 : vector<1x32xf32> to vector<8x32xf32>
    %60 = arith.addf %58, %59 : vector<8x32xf32>
    %c1_24 = arith.constant 1 : index
    %c0_25 = arith.constant 0 : index
    %c0_26 = arith.constant 0 : index
    %61 = vector.load %arg7[%c1_24, %c0_25, %c0_26] : memref<2x8x32xf32, #tpu.memory_space<vmem>>, vector<1x8x32xf32>
    %62 = vector.shape_cast %61 : vector<1x8x32xf32> to vector<8x32xf32>
    %63 = vector.shape_cast %60 : vector<8x32xf32> to vector<1x8x32xf32>
    tpu.vector_store %arg7[%c1_24, %c0_25, %c0_26], %63 {strides = array<i32>} : memref<2x8x32xf32, #tpu.memory_space<vmem>>, vector<1x8x32xf32>,
    return
  }
  func.func @transform_0(%arg0: i32, %arg1: i32) -> (i32, i32, i32, i32) {
    %c0_i32 = arith.constant 0 : i32
    %c0_i32_0 = arith.constant 0 : i32
    %c0_i32_1 = arith.constant 0 : i32
    return %arg0, %arg1, %c0_i32, %c0_i32_0 : i32, i32, i32, i32
  }
  func.func @transform_1(%arg0: i32, %arg1: i32) -> (i32, i32) {
    %c0_i32 = arith.constant 0 : i32
    %c0_i32_0 = arith.constant 0 : i32
    %c0_i32_1 = arith.constant 0 : i32
    return %c0_i32, %c0_i32_0 : i32, i32
  }
  func.func @transform_2(%arg0: i32, %arg1: i32) -> (i32, i32) {
    %c0_i32 = arith.constant 0 : i32
    %c0_i32_0 = arith.constant 0 : i32
    %c0_i32_1 = arith.constant 0 : i32
    return %c0_i32, %c0_i32_0 : i32, i32
  }
  func.func @transform_3(%arg0: i32, %arg1: i32) -> (i32, i32) {
    %c0_i32 = arith.constant 0 : i32
    %c0_i32_0 = arith.constant 0 : i32
    %c0_i32_1 = arith.constant 0 : i32
    return %c0_i32, %c0_i32_0 : i32, i32
  }
  func.func @transform_4(%arg0: i32, %arg1: i32) -> (i32, i32) {
    %c0_i32 = arith.constant 0 : i32
    %c0_i32_0 = arith.constant 0 : i32
    %c0_i32_1 = arith.constant 0 : i32
    return %c0_i32, %c0_i32_0 : i32, i32
  }
  func.func @transform_5(%arg0: i32, %arg1: i32) -> (i32, i32, i32) {
    %c0_i32 = arith.constant 0 : i32
    %c0_i32_0 = arith.constant 0 : i32
    return %arg0, %arg1, %c0_i32 : i32, i32, i32
  }
}

</mosaic_0001>

<bundles_post_ra>
// kernel: tpu_custom_call.1
= control target key start
LH: loop header
LB: loop body
LE: loop exit
PB: predicated region body
PF: predicated region fallthrough
CT: control target
= control target key end

     0   :  { %10 = vsyncpa [#allocation4], 0  ;;  %s1179_s0 = inlined_call_operand.vmem [shape: f32[2,2,12,32], index: 0, kind: input, shape index: {}]   ;;  %s1180_s1 = inlined_call_operand.vmem [shape: f32[96,64], index: 1, kind: input, shape index: {}]   ;;  %s1181_s2 = inlined_call_operand.vmem [shape: f32[1,64], index: 2, kind: input, shape index: {}]   ;;  %s1182_s3 = inlined_call_operand.vmem [shape: f32[192,32], index: 3, kind: input, shape index: {}]   ;;  %s1183_s4 = inlined_call_operand.vmem [shape: f32[1,32], index: 4, kind: input, shape index: {}]   ;;  %s1184_s5 = inlined_call_operand.hbm [shape: f32[2,16,32], index: 5, kind: output, shape index: {}]  }
   0x1   :  { %12 = vsyncpa [#allocation4 + $0x1], 0  ;;  %s891_s18 = smov 0   ;;  %s893_s19 = smov 0  }
   0x2   :  { %s895_s20 = smov 0   ;;  %s897_s21 = smov 0  }
   0x3   :  { %s899_s22 = smov 0   ;;  %s901_s23 = smov 0  }
   0x4 LB: > { %s688_s24 = sadd.s32 4294967295, %s854_s23   ;;  %s689_s25 = sadd.s32 4294967294, %s854_s23   ;;  %s854_s23 = sphi %s901_s23, %s18_s23   ;;  %s850_s22 = sphi %s899_s22, %s1195_s22   ;;  %s846_s21 = sphi %s897_s21, %s1194_s21   ;;  %s842_s20 = sphi %s895_s20, %s1193_s20   ;;  %s838_s19 = sphi %s893_s19, %s1192_s19   ;;  %s834_s18 = sphi %s891_s18, %s1191_s18  }
   0x5   : > { %s27_s26 = sadd.s32 1, %s850_s22  ;;  %s39_s27 = sadd.s32 1, %s842_s20 }
   0x6   : > { %p28_p0 = scmp.ge.s32.totalorder %s27_s26, 2  ;;  %p46_p1 = scmp.ne.s32.totalorder %s842_s20, %s838_s19 }
   0x7   : > { %p47_p2 = scmp.eq.s32.totalorder %s854_s23, 0  ;;  %p162_p3 = scmp.eq.s32.totalorder %s688_s24, 1 }
   0x8   : > { %s1197_s26 = smov (%p28_p0, %s27_s26), 0  ;;  %p167_p6 = scmp.ne.s32.totalorder %s838_s19, %s834_s18 }
   0x9   : > { %p48_p4 = por %p47_p2, %p46_p1  ;;  %p930_p5 = por %p162_p3, %p46_p1 }
   0xa   : > { %s35_s29 = ssub.s32 %s850_s22, %s1197_s26  ;;  %p168_p8 = scmp.eq.s32.totalorder %s689_s25, 1 }
   0xb   : > { %p37_p7 = scmp.eq.s32.totalorder %s35_s29, 0  ;;  %p691_p10 = scmp.ge.s32.totalorder %s854_s23, 2 }
   0xc   : > { %p941_p9 = por %p168_p8, %p167_p6 }
   0xd   : > { %s939_s30 = scalar_select %p37_p7, %s842_s20, %s39_s27  }
   0xe   : > { %196 = sbr.rel (%p691_p10) target bundleno = 27 (0x1b), region = 32 }
  0x13   : > { %199 = sbr.rel (!%p48_p4) target bundleno = 27 (0x1b), region = 36  ;;  %s201_s7 = sand.u32 (%p48_p4), 1, %s842_s20  }
  0x14   : > { %s713_s8 = sshll.u32 (%p48_p4), %s850_s22, 4  ;;  %s692_s9 = sshll.u32 (%p48_p4), %s201_s7, 5 }
  0x15   : > { %s209_s12 = scalar_lea.vmem (%p48_p4), %s1179_s0, %s713_s8  ;;  %s203_s13 = scalar_lea.vmem (%p48_p4), [#allocation2], %s692_s9 }
  0x16   : > { %v244_v0 = vld [vmem:[%s209_s12] sm:$0xff] (%p48_p4)  ;;  %v246_v1 = vld [vmem:[%s209_s12 + $0x8] sm:$0xff] (%p48_p4) }
  0x17   : > { %v248_v2 = vld [vmem:[%s209_s12 + $0x20] sm:$0xff] (%p48_p4)  ;;  %245 = vst [vmem:[%s203_s13] sm:$0xff] (%p48_p4), %v244_v0  ;;  %v250_v3 = vld [vmem:[%s209_s12 + $0x28] sm:$0xff] (%p48_p4) }
  0x18   : > { %247 = vst [vmem:[%s203_s13 + $0x8] sm:$0xff] %v246_v1 }
  0x19   : > { %249 = vst [vmem:[%s203_s13 + $0x10] sm:$0xff] %v248_v2 }
  0x1a   : > { %251 = vst [vmem:[%s203_s13 + $0x18] sm:$0xff] %v250_v3 }
  0x1b PF: > { %p695_p11 = scmp.ge.s32.totalorder %s854_s23, 1  ;;  %p256_p12 = scmp.lt.s32.totalorder %s854_s23, 3 }
  0x1d   : > { %p257_p13 = pnand %p695_p11, %p256_p12 }
  0x1e   : > { %s956_s14 = sand.u32 (!%p257_p13), 1, %s838_s19   ;;  %s856_s10 = smov (!%p257_p13), 32  }
  0x1f   : > { %260 = sbr.rel (%p257_p13) target bundleno = 560 (0x230), region = 74  ;;  %s696_s25 = sshll.u32 (!%p257_p13), %s956_s14, 5 }
  0x20   : > { %s265_s7 = scalar_lea.vmem (!%p257_p13), [#allocation2], %s696_s25  ;;  %s857_s24 = smov (!%p257_p13), 64  }
  0x21   : > { %s698_s8 = sshll.u32 (!%p257_p13), %s846_s21, 3  ;;  %s697_s25 = sshll.u32 (!%p257_p13), %s956_s14, 4 }
  0x22   : > { %s289_s27 = scalar_lea.vmem (!%p257_p13), [#allocation3], %s697_s25  ;;  %s603_s9 = scalar_lea.hbm (!%p257_p13), %s1184_s5, %s698_s8 }
  0x23   : > { %s606_s11 = sshll.u32 (!%p257_p13), %s603_s9, 4  ;;  %s590_s12 = scalar_lea.sflag (!%p257_p13), [#allocation4], %s956_s14  ;;  %s607_s11 = int_to_ptr.hbm [resolvable:$true] %s606_s11 }
  0x24   : > { %v303_v4 = vld [vmem:[%s1180_s1 + $0x58] sm:$0xff]  ;;  %v302_v5 = vld [vmem:[%s1180_s1 + $0x50] sm:$0xff]  ;;  %v301_v6 = vld [vmem:[%s1180_s1 + $0x48] sm:$0xff]  ;;  %vm348_vm0 = vcmask 1046528   ;;  %vm358_vm1 = vcmask 1045504   ;;  %vm368_vm2 = vcmask 261120   ;;  %v332_v58 = vlaneseq }
  0x25   : > { %388 = vmatpush.msra.mxu0 %v303_v4  ;;  %510 = vmatpush.msra.mxu3 %v303_v4  ;;  %v968_v7 = vld [vmem:[%s265_s7 + $0x18] sm:$0xf]  ;;  %v970_v8 = vld [vmem:[%s265_s7 + $0x10] sm:$0xff]  ;;  %v972_v9 = vld [vmem:[%s265_s7 + $0x8] sm:$0xf]  ;;  %vm371_vm3 = vcmask 523264  }
  0x26   : > { %v479_v10 = vrot.slane %v968_v7, 1  ;;  %v478_v11 = vrot.slane %v970_v8, 1  ;;  %v344_v12 = vld [vmem:[%s265_s7] sm:$0xff]  ;;  %v350_v14 = vrot.slane %v972_v9, 1  ;;  %v299_v17 = vld [vmem:[%s1180_s1 + $0x38] sm:$0xff]  ;;  %v488_v19 = vrot.slane %v968_v7, 2 }
  0x27   : > { %389 = vmatpush.msra.mxu0 %v302_v5  ;;  %511 = vmatpush.msra.mxu3 %v302_v5  ;;  %v300_v13 = vld [vmem:[%s1180_s1 + $0x40] sm:$0xff]  ;;  %v349_v15 = vrot.slane %v344_v12, 1  ;;  %v487_v20 = vrot.slane %v970_v8, 2  ;;  %v298_v21 = vld [vmem:[%s1180_s1 + $0x30] sm:$0xff]  ;;  %v359_v22 = vrot.slane %v344_v12, 2  ;;  %v297_v23 = vld [vmem:[%s1180_s1 + $0x28] sm:$0xff] }
  0x28   : > { %483 = vrot.lane.b32.xlu1 %v479_v10, %s856_s10  ;;  %v480_v16 = vsel %vm348_vm0, %v478_v11, %v479_v10  ;;  %v360_v24 = vrot.slane %v972_v9, 2  ;;  %v296_v27 = vld [vmem:[%s1180_s1 + $0x20] sm:$0xff]  ;;  %v295_v28 = vld [vmem:[%s1180_s1 + $0x18] sm:$0xff]  ;;  %v294_v29 = vld [vmem:[%s1180_s1 + $0x10] sm:$0xff]  ;;  %vm377_vm4 = vcmask 785408   ;;  %v333_v61 = vshrl.u32 %v332_v58, 7 }
  0x29   : > { %390 = vmatpush.msra.mxu0 %v301_v6  ;;  %512 = vmatpush.msra.mxu3 %v301_v6  ;;  %v351_v18 = vsel %vm348_vm0, %v349_v15, %v350_v14  ;;  %v489_v25 = vsel %vm358_vm1, %v487_v20, %v488_v19  ;;  %v293_v30 = vld [vmem:[%s1180_s1 + $0x8] sm:$0xff]  ;;  %v292_v31 = vld [vmem:[%s1180_s1] sm:$0xff]  ;;  %v327_v48 = vld [vmem:[%s1182_s3 + $0xb8] sm:$0xff]  ;;  %s790_s13 = sshra.s32 %s607_s11, 4  ;;  %s791_s13 = int_to_ptr.hbm [resolvable:$true] %s790_s13 }
  0x2a   : > { %481 = vrot.lane.b32.xlu0 %v480_v16, %s856_s10  ;;  %352 = vrot.lane.b32.xlu2 %v351_v18, %s856_s10  ;;  %v361_v26 = vsel %vm358_vm1, %v359_v22, %v360_v24  ;;  %v326_v49 = vld [vmem:[%s1182_s3 + $0xb0] sm:$0xff]  ;;  %v325_v50 = vld [vmem:[%s1182_s3 + $0xa8] sm:$0xff]  ;;  %v334_v3 = vadd.s32 8, %v333_v61  ;;  %s792_s15 = scalar_lea.hbm %s791_s13, 16  ;;  %p797_p3 = scmp.lt.s32.totalorder %s791_s13, %s1184_s5 }
  0x2b   : > { %391 = vmatpush.msra.mxu0 %v300_v13  ;;  %513 = vmatpush.msra.mxu3 %v300_v13  ;;  %v324_v51 = vld [vmem:[%s1182_s3 + $0xa0] sm:$0xff]  ;;  %v323_v52 = vld [vmem:[%s1182_s3 + $0x98] sm:$0xff]  ;;  %v322_v53 = vld [vmem:[%s1182_s3 + $0x90] sm:$0xff]  ;;  %p793_p0 = scmp.ne.s32.totalorder %s791_s13, %s792_s15 }
  0x2c   : > { %460 = vmatpush.msra.mxu2 %v327_v48  ;;  %v321_v54 = vld [vmem:[%s1182_s3 + $0x88] sm:$0xff]  ;;  %v320_v55 = vld [vmem:[%s1182_s3 + $0x80] sm:$0xff]  ;;  %v319_v56 = vld [vmem:[%s1182_s3 + $0x78] sm:$0xff] }
  0x2d   : > { %392 = vmatpush.msra.mxu0 %v299_v17  ;;  %514 = vmatpush.msra.mxu3 %v299_v17  ;;  %v318_v57 = vld [vmem:[%s1182_s3 + $0x70] sm:$0xff]  ;;  %v317_v59 = vld [vmem:[%s1182_s3 + $0x68] sm:$0xff]  ;;  %v316_v60 = vld [vmem:[%s1182_s3 + $0x60] sm:$0xff]  ;;  %p794_p1 = pnand %p793_p0, %p930_p5 }
  0x2e   : > { %461 = vmatpush.msra.mxu2 %v326_v49  ;;  %432 = vmatpush.msra.mxu1 %v319_v56  ;;  %v315_v62 = vld [vmem:[%s1182_s3 + $0x58] sm:$0xff]  ;;  %v774_v0 = vld [vmem:[%s1181_s2] ss:$0 sm:$0xff]  ;;  %v314_v1 = vld [vmem:[%s1182_s3 + $0x50] sm:$0xff] }
  0x2f   : > { %393 = vmatpush.msra.mxu0 %v298_v21  ;;  %515 = vmatpush.msra.mxu3 %v298_v21  ;;  %v313_v5 = vld [vmem:[%s1182_s3 + $0x48] sm:$0xff]  ;;  %v308_v20 = vld [vmem:[%s1182_s3 + $0x20] sm:$0xff]  ;;  %p795_p2 = pneg %p794_p1 }
  0x30   : > { %492 = vrot.lane.b32.xlu1 %v488_v19, %s857_s24  ;;  %462 = vmatpush.msra.mxu2 %v325_v50  ;;  %v309_v16 = vld [vmem:[%s1182_s3 + $0x28] sm:$0xff] }
  0x31   : > { %394 = vmatpush.msra.mxu0 %v297_v23  ;;  %516 = vmatpush.msra.mxu3 %v297_v23  ;;  %v307_v23 = vld [vmem:[%s1182_s3 + $0x18] sm:$0xff] }
  0x32   : > { %490 = vrot.lane.b32.xlu0 %v489_v25, %s857_s24  ;;  %362 = vrot.lane.b32.xlu2 %v361_v26, %s857_s24 }
  0x33   : > { %395 = vmatpush.msra.mxu0 %v296_v27  ;;  %517 = vmatpush.msra.mxu3 %v296_v27 }
  0x34   : > { %463 = vmatpush.msra.mxu2 %v324_v51  ;;  %433 = vmatpush.msra.mxu1 %v318_v57 }
  0x35   : > { %396 = vmatpush.msra.mxu0 %v295_v28  ;;  %518 = vmatpush.msra.mxu3 %v295_v28 }
  0x36   : > { %464 = vmatpush.msra.mxu2 %v323_v52  ;;  %434 = vmatpush.msra.mxu1 %v317_v59 }
  0x37   : > { %397 = vmatpush.msra.mxu0 %v294_v29  ;;  %519 = vmatpush.msra.mxu3 %v294_v29 }
  0x38   : > { %364 = vrot.lane.b32.xlu1 %v360_v24, %s857_s24  ;;  %465 = vmatpush.msra.mxu2 %v322_v53 }
  0x39   : > { %398 = vmatpush.msra.mxu0 %v293_v30  ;;  %520 = vmatpush.msra.mxu3 %v293_v30 }
  0x3a   : > { %354 = vrot.lane.b32.xlu0 %v350_v14, %s856_s10  ;;  %466 = vmatpush.msra.mxu2 %v321_v54  ;;  %s699_s10 = sadd.s32 4294967295, %s698_s8  ;;  %s796_s8 = scalar_lea.hbm %s1184_s5, 32 }
  0x3b   : > { %399 = vmatpush.msra.mxu0 %v292_v31  ;;  %521 = vmatpush.msra.mxu3 %v292_v31  ;;  %v335_v63 = vstv %s699_s10  ;;  %v306_v31 = vld [vmem:[%s1182_s3 + $0x10] sm:$0xff]  ;;  %s604_s10 = sshll.u32 %s289_s27, 4  ;;  %p798_p4 = scmp.lt.s32.totalorder %s796_s8, %s792_s15  ;;  %s605_s10 = int_to_ptr.vmem [resolvable:$true] %s604_s10 }
  0x3c   : > { %467 = vmatpush.msra.mxu2 %v320_v55  ;;  %435 = vmatpush.msra.mxu1 %v316_v60  ;;  %v336_v4 = vadd.s32 %v335_v63, %v333_v61 }
  0x3d   : > { %575 = vmatpush.msrb.mxu0 %v327_v48  ;;  %p799_p6 = por %p798_p4, %p797_p3 }
  0x3e   : > { %547 = vmatpush.msrb.mxu2 %v319_v56  ;;  %436 = vmatpush.msra.mxu1 %v315_v62  ;;  %vm338_vm5 = vcmp.ge.s32.totalorder %v336_v4, 0  ;;  %vm340_vm6 = vcmp.lt.s32.totalorder %v336_v4, 16 }
  0x3f   : > { %576 = vmatpush.msrb.mxu0 %v326_v49  ;;  %vm1090_vm7 = vmand %vm338_vm5, %vm340_vm6  ;;  %p800_p7 = pnand %p799_p6, %p795_p2 }
  0x40   : > { %548 = vmatpush.msrb.mxu2 %v318_v57  ;;  %437 = vmatpush.msra.mxu1 %v314_v1 }
  0x41   : > { %577 = vmatpush.msrb.mxu0 %v325_v50  ;;  %v775_v50 = vld [vmem:[%s1183_s4] ss:$0 sm:$0xff] }
  0x42   : > { %549 = vmatpush.msrb.mxu2 %v317_v59  ;;  %438 = vmatpush.msra.mxu1 %v313_v5 }
  0x43   : > { %578 = vmatpush.msrb.mxu0 %v324_v51 }
  0x44   : > { %550 = vmatpush.msrb.mxu2 %v316_v60 }
  0x45   : > { %579 = vmatpush.msrb.mxu0 %v323_v52 }
  0x46   : > { %551 = vmatpush.msrb.mxu2 %v315_v62 }
  0x47   : > { %580 = vmatpush.msrb.mxu0 %v322_v53 }
  0x48   : > { %552 = vmatpush.msrb.mxu2 %v314_v1 }
  0x49   : > { %581 = vmatpush.msrb.mxu0 %v321_v54 }
  0x4a   : > { %553 = vmatpush.msrb.mxu2 %v313_v5 }
  0x4b   : > { %582 = vmatpush.msrb.mxu0 %v320_v55 }
  0x84   : > { %v353_v32 = vpop.permute.xlu2 %352 }
  0x85   : > { %v369_v33 = vsel %vm368_vm2, %v344_v12, %v353_v32  ;;  %v310_v12 = vld [vmem:[%s1182_s3 + $0x30] sm:$0xff] }
  0x8c   : > { %v363_v34 = vpop.permute.xlu2 %362 }
  0x8d   : > { %v372_v35 = vsel %vm371_vm3, %v369_v33, %v363_v34 }
  0x8e   : > { %700 = vmatmul.msk.f32.vlgmr.msra.gmra.mxu0 %vm377_vm4, %v372_v35 }
  0x9a   : > { %v484_v36 = vpop.permute.xlu1 %483 }
  0x9b   : > { %v497_v43 = vsel %vm368_vm2, %v968_v7, %v484_v36  ;;  %v312_v7 = vld [vmem:[%s1182_s3 + $0x40] sm:$0xff]  ;;  %v305_v36 = vld [vmem:[%s1182_s3 + $0x8] sm:$0xff] }
  0x9c   : > { %v482_v37 = vpop.permute.xlu0 %481  ;;  %554 = vmatpush.msrb.mxu2 %v312_v7  ;;  %439 = vmatpush.msra.mxu1 %v312_v7 }
  0x9d   : > { %v496_v39 = vsel %vm368_vm2, %v970_v8, %v482_v37  ;;  %v337_v8 = vadd.s32 %v335_v63, %v334_v3 }
  0x9f   : > { %vm339_vm8 = vcmp.ge.s32.totalorder %v337_v8, 0  ;;  %vm341_vm9 = vcmp.lt.s32.totalorder %v337_v8, 16 }
  0xa0   : > { %vm1099_vm10 = vmand %vm339_vm8, %vm341_vm9 }
  0xa2   : > { %v493_v38 = vpop.permute.xlu1 %492 }
  0xa3   : > { %v499_v46 = vsel %vm371_vm3, %v497_v43, %v493_v38 }
  0xa4   : > { %v491_v40 = vpop.permute.xlu0 %490 }
  0xa5   : > { %v498_v41 = vsel %vm371_vm3, %v496_v39, %v491_v40 }
  0xa6   : > { %705 = vmatmul.msk.f32.vlgmr.msra.gmra.mxu3 %vm377_vm4, %v498_v41 }
  0xaa   : > { %v365_v42 = vpop.permute.xlu1 %364 }
  0xac   : > { %v355_v44 = vpop.permute.xlu0 %354 }
  0xad   : > { %v370_v45 = vsel %vm368_vm2, %v972_v9, %v355_v44  ;;  %v311_v9 = vld [vmem:[%s1182_s3 + $0x38] sm:$0xff]  ;;  %v304_v44 = vld [vmem:[%s1182_s3] sm:$0xff] }
  0xae   : > { %706 = vmatmul.msk.f32.gmra.mxu3 %vm377_vm4, %v499_v46  ;;  %v373_v47 = vsel %vm371_vm3, %v370_v45, %v365_v42  ;;  %555 = vmatpush.msrb.mxu2 %v311_v9 }
  0xaf   : > { %701 = vmatmul.msk.f32.gmra.mxu0 %vm377_vm4, %v373_v47  ;;  %440 = vmatpush.msra.mxu1 %v311_v9 }
  0xb0   : > { %556 = vmatpush.msrb.mxu2 %v310_v12 }
  0xb1   : > { %441 = vmatpush.msra.mxu1 %v310_v12 }
  0xb2   : > { %557 = vmatpush.msrb.mxu2 %v309_v16 }
  0xb3   : > { %442 = vmatpush.msra.mxu1 %v309_v16 }
  0xb4   : > { %558 = vmatpush.msrb.mxu2 %v308_v20 }
  0xb5   : > { %443 = vmatpush.msra.mxu1 %v308_v20 }
  0xb6   : > { %559 = vmatpush.msrb.mxu2 %v307_v23 }
  0xb7   : > { %444 = vmatpush.msra.mxu1 %v307_v23 }
  0xb8   : > { %560 = vmatpush.msrb.mxu2 %v306_v31 }
  0xb9   : > { %445 = vmatpush.msra.mxu1 %v306_v31 }
  0xba   : > { %561 = vmatpush.msrb.mxu2 %v305_v36 }
  0xbb   : > { %446 = vmatpush.msra.mxu1 %v305_v36 }
  0xbc   : > { %562 = vmatpush.msrb.mxu2 %v304_v44 }
  0xbd   : > { %447 = vmatpush.msra.mxu1 %v304_v44 }
 0x10b   : > { %v401_v2 = vpop.f32.mrf.mxu0 }
 0x10c   : > { %v402_v6 = vadd.f32 %v774_v0, %v401_v2 }
 0x10e   : > { %v407_v11 = vmax.f32 %v402_v6, 0.0 }
 0x110   : > { %v413_v18 = vsel %vm1090_vm7, %v407_v11, 0.0 }
 0x111   : > { %v417_v24 = vrot.slane %v413_v18, 1  ;;  %v423_v27 = vrot.slane %v413_v18, 2 }
 0x129   : > { %v523_v10 = vpop.f32.mrf.mxu3 }
 0x12a   : > { %v524_v14 = vadd.f32 %v774_v0, %v523_v10 }
 0x12c   : > { %v404_v15 = vpop.f32.mrf.mxu0  ;;  %v529_v22 = vmax.f32 %v524_v14, 0.0 }
 0x12d   : > { %v405_v17 = vadd.f32 %v774_v0, %v404_v15 }
 0x12e   : > { %v531_v32 = vsel %vm1090_vm7, %v529_v22, 0.0 }
 0x12f   : > { %v408_v21 = vmax.f32 %v405_v17, 0.0  ;;  %v535_v38 = vrot.slane %v531_v32, 1  ;;  %v541_v39 = vrot.slane %v531_v32, 2 }
 0x131   : > { %v414_v25 = vsel %vm1099_vm10, %v408_v21, 0.0  ;;  %v526_v26 = vpop.f32.mrf.mxu3 }
 0x132   : > { %v418_v28 = vrot.slane %v414_v25, 1  ;;  %v424_v29 = vrot.slane %v414_v25, 2  ;;  %v527_v30 = vadd.f32 %v774_v0, %v526_v26 }
 0x134   : > { %v530_v33 = vmax.f32 %v527_v30, 0.0  ;;  %v425_v34 = vsel %vm358_vm1, %v423_v27, %v424_v29  ;;  %v419_v35 = vsel %vm348_vm0, %v417_v24, %v418_v28 }
 0x135   : > { %702 = vmatmul.msk.f32.vlgmr.msra.gmra.mxu2 %vm371_vm3, %v425_v34  ;;  %420 = vrot.lane.b32.xlu0 %v419_v35, %s857_s24 }
 0x136   : > { %v532_v37 = vsel %vm1099_vm10, %v530_v33, 0.0 }
 0x137   : > { %v536_v40 = vrot.slane %v532_v37, 1  ;;  %v542_v41 = vrot.slane %v532_v37, 2 }
 0x139   : > { %v537_v42 = vsel %vm348_vm0, %v535_v38, %v536_v40  ;;  %v543_v43 = vsel %vm358_vm1, %v541_v39, %v542_v41 }
 0x13a   : > { %538 = vrot.lane.b32.xlu2 %v537_v42, %s857_s24  ;;  %707 = vmatmul.msk.f32.vlgmr.msrb.gmra.mxu0 %vm371_vm3, %v543_v43 }
 0x194   : > { %v539_v45 = vpop.permute.xlu2 %538 }
 0x195   : > { %v544_v46 = vsel %vm371_vm3, %v531_v32, %v539_v45 }
 0x196   : > { %563 = vmatmul.f32.vlgmr.msrb.gmra.mxu2 %v544_v46 }
 0x1a7   : > { %v421_v47 = vpop.permute.xlu0 %420 }
 0x1a8   : > { %v426_v48 = vsel %vm371_vm3, %v413_v18, %v421_v47 }
 0x1a9   : > { %448 = vmatmul.f32.vlgmr.msra.gmra.mxu1 %v426_v48 }
 0x1b7   : > { %v584_v53 = vpop.f32.mrf.mxu0 }
 0x1b8   : > { %v469_v49 = vpop.f32.mrf.mxu2 }
 0x219   : > { %v564_v51 = vpop.f32.mrf.mxu2 }
 0x21a   : > { %v565_v52 = vadd.f32 %v775_v50, %v564_v51 }
 0x21c   : > { %v585_v54 = vadd.f32 %v584_v53, %v565_v52 }
 0x21e   : > { %708 = vst.msk [vmem:[%s289_s27 + $0x8] sm:$0xff] %vm368_vm2, %v585_v54 }
 0x226   : > { %v449_v55 = vpop.f32.mrf.mxu1 }
 0x227   : > { %v450_v56 = vadd.f32 %v775_v50, %v449_v55 }
 0x229   : > { %v470_v57 = vadd.f32 %v469_v49, %v450_v56 }
 0x22b   : > { %472 = vst.msk [vmem:[%s289_s27] sm:$0xff] %vm368_vm2, %v470_v57 }
 0x22c   : > { %803 = shalt.err (!%p800_p7)
}
 0x22d   : > { %s858_s14 = smov 128   ;;  %s859_s25 = smov 256  }
 0x22e   : > { %s860_s27 = smov 8  }
 0x22f   : > { %714 = dma.vmem_to_hbm [thread:$0]  (%p930_p5), %s605_s10, 256, %s607_s11, %s590_s12, %s858_s14, %s859_s25, %s860_s27  }
 0x230 PF: > { %s621_s29 = sand.u32 1, %s834_s18   ;;  %p717_p8 = pnand %p691_p10, %p941_p9 }
 0x231   : > { %s622_s7 = scalar_lea.sflag [#allocation4], %s621_s29 }
 0x232   : > { %p718_p11 = pneg %p717_p8 }
 0x234   : > { %829 = dma.done.wait (%p718_p11), %s622_s7, 256  }
 0x235   : > { %831 = vsyncadd (%p718_p11), %s622_s7, 4294967040  ;;  %s18_s23 = sadd.s32 1, %s854_s23   ;;  %s1191_s18 = smov %s838_s19 }
 0x236   : > { %p15_p12 = scmp.ge.s32.totalorder %s18_s23, 4   ;;  %s1192_s19 = smov %s842_s20 }
 0x237   : > { %s1193_s20 = smov %s939_s30  ;;  %s1194_s21 = smov %s850_s22 }
 0x238   : > { %s1195_s22 = smov %s1197_s26  ;;  %17 = sbr.rel (!%p15_p12) target bundleno = 4 (0x4), region = 120 }
 0x23d   :  { %628 = vsyncpa [#allocation4], 1 }
 0x23e   :  { %630 = vsyncpa [#allocation4 + $0x1], 1 }

</bundles_post_ra>
